<compile_context>
chip_gen: v5e
topology: v5e:2x2
jax: 0.10.0
libtpu: 0.0.40
codegen_flags: <defaults>
</compile_context>

<pallas_src>
import functools
import math

import jax
import jax.numpy as jnp
from jax.experimental import pallas as pl
from jax.experimental.pallas import tpu as pltpu


def _round_up(x, m):
    return (x + m - 1) // m * m


def _itemsize(dt):
    return jnp.dtype(dt).itemsize


def _is_v7x():
    try:
        kind = jax.devices()[0].device_kind.lower()
    except Exception:
        return False
    return "v7" in kind


def _choose_time_chunk(T, max_chunk):
    """Largest divisor of T <= max_chunk (avoids padded timesteps) unless it is
    much smaller than max_chunk, in which case pad (tail guarded in-kernel)."""
    max_chunk = max(1, min(max_chunk, T))
    best = 1
    for c in range(1, max_chunk + 1):
        if T % c == 0:
            best = c
    if best >= max(1, max_chunk // 2):
        return best
    return max_chunk


# ---------------------------------------------------------------------------
# Fused kernel: per-chunk input projection + sequential leaky-RNN recurrence
# ---------------------------------------------------------------------------
def rnn_fused_kernel(h0_ref, x_ref, wih_t_ref, whh_t_ref, b_ref,
                     out_ref, hfin_ref, h_scratch, g_scratch, *,
                     decay, total_t, hoist_whh, guard_tail):
    tt, bt, isz = x_ref.shape
    hp = whh_t_ref.shape[1]
    t_chunk = pl.program_id(1)

    # (Re-)initialize the carried hidden state at the start of each batch block.
    @pl.when(t_chunk == 0)
    def _():
        h_scratch[...] = h0_ref[...]

    # Fused, time-parallel input projection for this chunk:
    #   G = x_chunk @ W_ih^T + bias  with M = Tt*Bt rows (fills the MXU).
    # Result stays in VMEM scratch -- no HBM round trip of G.
    x_flat = x_ref[...].reshape(tt * bt, isz)
    g = jnp.dot(x_flat, wih_t_ref[...],
                preferred_element_type=jnp.float32) + b_ref[...]
    g_scratch[...] = g.reshape(tt, bt, hp)

    # Valid (non-padded) timesteps in this chunk; padded tail steps must not
    # advance h so that the emitted final hidden state is exactly h_{T-1}.
    if guard_tail:
        valid = jnp.minimum(jnp.maximum(total_t - t_chunk * tt, 0), tt)

    one_minus_decay = 1.0 - decay

    # Hoist W_hh^T into vregs only when it fits comfortably in the 64-vreg
    # budget; otherwise stream it from VMEM inside the loop (Mosaic handles it).
    whh_hoisted = whh_t_ref[...] if hoist_whh else None
    # TODO(synk): hold W_hh^T in MXU weight registers across the unrolled loop
    # via pltpu.matmul_push_rhs / matmul_acc_lhs / matmul_pop to remove the
    # per-step weight push from the serial critical path.

    def step(i, h):
        whh = whh_hoisted if hoist_whh else whh_t_ref[...]
        gates = g_scratch[i] + jnp.dot(h.astype(whh.dtype), whh,
                                       preferred_element_type=jnp.float32)
        h_new = decay * h + one_minus_decay * jnp.tanh(gates)
        if guard_tail:
            h_new = jnp.where(i < valid, h_new, h)
        out_ref[i] = h_new.astype(out_ref.dtype)
        return h_new

    h_final = jax.lax.fori_loop(0, tt, step, h_scratch[...], unroll=True)
    h_scratch[...] = h_final
    hfin_ref[...] = h_final            # f32 final hidden (exact precision)


# ---------------------------------------------------------------------------
# Wrapper
# ---------------------------------------------------------------------------
def rnn_layer_forward(x, hidden_init, weight_ih, weight_hh, bias, decay=0.9,
                      *, time_chunk=None, use_bf16=True):
    """x: (T, B, I); hidden_init: (1, B, H); weight_ih: (H, I);
       weight_hh: (H, H); bias: (H,).
       Returns (outputs (T, B, H) in x.dtype, final hidden (B, H))."""
    T, B, I = x.shape
    H = weight_hh.shape[0]

    f32 = jnp.float32
    mxu_dtype = jnp.bfloat16 if use_bf16 else f32
    out_dtype = x.dtype

    Hp = _round_up(H, 128)        # lane-dense hidden dim
    Bp = _round_up(B, 8)          # sublane-aligned batch

    v7x = _is_v7x()

    # v7x: two batch blocks so each TensorCore carries an independent hidden
    # state (real "parallel" axis). v5e/v6e (1 TC): one block, no overhead.
    if v7x and Bp >= 16 and Bp % 16 == 0:
        Bt = Bp // 2
    else:
        Bt = Bp
    nB = Bp // Bt

    # Time-chunk sizing: amortize per-grid-step overhead, bounded by a VMEM
    # budget for the pipelined x/out buffers + G scratch (v7x has 64 MiB VMEM).
    if time_chunk is None:
        time_chunk = 32 if v7x else 64
    per_step_bytes = Bt * (2 * I * _itemsize(mxu_dtype)
                           + 2 * Hp * _itemsize(out_dtype)
                           + Hp * 4)
    vmem_budget = (20 if v7x else 40) << 20
    tt_cap = max(1, vmem_budget // max(1, per_step_bytes))
    Tt = _choose_time_chunk(T, min(time_chunk, tt_cap))
    Tp = _round_up(T, Tt)
    nT = Tp // Tt
    guard_tail = Tp != T

    # Zero-pad params / state into the lane-dense space (exact: padded hidden
    # lanes stay 0 for all t). x is built directly in the MXU dtype.
    wih_t = jnp.zeros((I, Hp), mxu_dtype).at[:, :H].set(
        weight_ih.T.astype(mxu_dtype))
    whh_t = jnp.zeros((Hp, Hp), mxu_dtype).at[:H, :H].set(
        weight_hh.T.astype(mxu_dtype))
    bias2d = jnp.zeros((1, Hp), f32).at[:, :H].set(bias.astype(f32))
    h0 = jnp.zeros((Bp, Hp), f32).at[:B, :H].set(hidden_init[0].astype(f32))
    x_pad = jnp.zeros((Tp, Bp, I), mxu_dtype).at[:T, :B].set(
        x.astype(mxu_dtype))

    # Hoist W_hh^T into vregs only if it fits ~<=24 vregs worth (spill guard).
    hoist_whh = Hp * Hp * _itemsize(mxu_dtype) <= 96 * 1024

    # VMEM footprint: weights single-buffered, x/out double-buffered, scratch.
    vmem_need = (
        I * Hp * _itemsize(mxu_dtype)
        + Hp * Hp * _itemsize(mxu_dtype)
        + Hp * 4
        + 2 * Bt * Hp * 4                               # h0 blocks
        + 2 * Tt * Bt * I * _itemsize(mxu_dtype)        # x chunks
        + 2 * Tt * Bt * Hp * _itemsize(out_dtype)       # out chunks
        + 2 * Bt * Hp * 4                               # hfin blocks
        + Bt * Hp * 4 + Tt * Bt * Hp * 4)               # scratch (h, G)
    vmem_limit = int(min(max(int(vmem_need * 1.3) + (2 << 20), 32 << 20),
                         110 << 20))

    kernel = functools.partial(rnn_fused_kernel, decay=float(decay),
                               total_t=T, hoist_whh=hoist_whh,
                               guard_tail=guard_tail)

    out_pad, hfin = pl.pallas_call(
        kernel,
        out_shape=(jax.ShapeDtypeStruct((Tp, Bp, Hp), out_dtype),
                   jax.ShapeDtypeStruct((Bp, Hp), f32)),
        grid_spec=pltpu.PrefetchScalarGridSpec(
            num_scalar_prefetch=0,
            grid=(nB, nT),
            in_specs=[
                pl.BlockSpec((Bt, Hp), lambda b, t: (b, 0)),           # h0
                pl.BlockSpec((Tt, Bt, I), lambda b, t: (t, b, 0)),     # x chunk
                pl.BlockSpec((I, Hp), lambda b, t: (0, 0),
                             pipeline_mode=pl.Buffered(1)),            # W_ih^T
                pl.BlockSpec((Hp, Hp), lambda b, t: (0, 0),
                             pipeline_mode=pl.Buffered(1)),            # W_hh^T
                pl.BlockSpec((1, Hp), lambda b, t: (0, 0),
                             pipeline_mode=pl.Buffered(1)),            # bias
            ],
            out_specs=(
                pl.BlockSpec((Tt, Bt, Hp), lambda b, t: (t, b, 0)),    # outputs
                pl.BlockSpec((Bt, Hp), lambda b, t: (b, 0)),           # final h
            ),
            scratch_shapes=[
                pltpu.VMEM((Bt, Hp), jnp.float32),       # carried h (f32)
                pltpu.VMEM((Tt, Bt, Hp), jnp.float32),   # fused G chunk
            ],
        ),
        compiler_params=pltpu.CompilerParams(
            dimension_semantics=("parallel", "arbitrary"),
            vmem_limit_bytes=vmem_limit),
    )(h0, x_pad, wih_t, whh_t, bias2d)

    outputs = out_pad[:T, :B, :H]
    h_final = hfin[:B, :H].astype(out_dtype)
    return outputs, h_final


def rnn_cell_forward(inp, hidden, weight_ih, weight_hh, bias, decay=0.9, **kw):
    """Single step, matching RNNCell.forward(input, hidden) exactly."""
    _, h_final = rnn_layer_forward(inp[None], hidden[None], weight_ih,
                                   weight_hh, bias, decay, **kw)
    return h_final


# ---------------------------------------------------------------------------
# Pure-JAX reference (matches PyTorch semantics) and init
# ---------------------------------------------------------------------------
def reference_forward(x, hidden_init, weight_ih, weight_hh, bias, decay=0.9):
    h = hidden_init[0]

    def step(h, x_t):
        act = jnp.tanh(x_t @ weight_ih.T + h @ weight_hh.T + bias)
        h_new = decay * h + (1.0 - decay) * act
        return h_new, h_new

    h_final, outs = jax.lax.scan(step, h, x)
    return outs, h_final


def init_params(key, input_size, hidden_size):
    """kaiming_uniform(a=sqrt(5)) init, matching PyTorch defaults."""
    k1, k2, k3 = jax.random.split(key, 3)
    bound_ih = 1.0 / math.sqrt(input_size)
    bound_hh = 1.0 / math.sqrt(hidden_size)
    weight_ih = jax.random.uniform(k1, (hidden_size, input_size), jnp.float32,
                                   -bound_ih, bound_ih)
    weight_hh = jax.random.uniform(k2, (hidden_size, hidden_size), jnp.float32,
                                   -bound_hh, bound_hh)
    bias_bound = 1.0 / math.sqrt(input_size)   # fan_in of weight_ih
    bias = jax.random.uniform(k3, (hidden_size,), jnp.float32,
                              -bias_bound, bias_bound)
    return weight_ih, weight_hh, bias


if __name__ == "__main__":
    T, B, I, H = 8, 8, 32, 32
    decay = 0.9

    key = jax.random.PRNGKey(0)
    kx, kh, kp = jax.random.split(key, 3)
    x = jax.random.normal(kx, (T, B, I), jnp.float32)
    hidden_init = jax.random.normal(kh, (1, B, H), jnp.float32)
    weight_ih, weight_hh, bias = init_params(kp, I, H)

    ref_outs, ref_h = reference_forward(x, hidden_init, weight_ih, weight_hh,
                                        bias, decay)

    # f32 MXU path: tight tolerance vs. the PyTorch-equivalent reference.
    outs, h_final = rnn_layer_forward(x, hidden_init, weight_ih, weight_hh,
                                      bias, decay, time_chunk=8,
                                      use_bf16=False)
    outs = jax.block_until_ready(outs)
    h_final = jax.block_until_ready(h_final)
    assert outs.shape == (T, B, H) and h_final.shape == (B, H)
    assert jnp.allclose(outs, ref_outs, atol=2e-5, rtol=2e-5)
    assert jnp.allclose(h_final, ref_h, atol=2e-5, rtol=2e-5)

    # Default bf16-MXU path (f32 carry + f32 accumulation): looser tolerance.
    outs_bf, h_bf = rnn_layer_forward(x, hidden_init, weight_ih, weight_hh,
                                      bias, decay)
    outs_bf = jax.block_until_ready(outs_bf)
    assert jnp.allclose(outs_bf, ref_outs, atol=5e-2)
    assert jnp.allclose(h_bf, ref_h, atol=5e-2)

    # Single-step cell, exactly the RNNCell.forward contract.
    h1 = rnn_cell_forward(x[0], hidden_init[0], weight_ih, weight_hh, bias,
                          decay, use_bf16=False)
    h1_ref = decay * hidden_init[0] + (1.0 - decay) * jnp.tanh(
        x[0] @ weight_ih.T + hidden_init[0] @ weight_hh.T + bias)
    h1 = jax.block_until_ready(h1)
    assert jnp.allclose(h1, h1_ref, atol=2e-5, rtol=2e-5)

    print("KERNEL_OK")
</pallas_src>

<mosaic_0001>
module attributes {stable_mosaic.version = 11 : i64} {
  func.func @rnn_fused_kernel(%arg0: i32, %arg1: i32, %arg2: memref<8x128xf32, #tpu.memory_space<vmem>>, %arg3: memref<8x8x32xf32, #tpu.memory_space<vmem>>, %arg4: memref<32x128xf32, #tpu.memory_space<vmem>>, %arg5: memref<128x128xf32, #tpu.memory_space<vmem>>, %arg6: memref<1x128xf32, #tpu.memory_space<vmem>>, %arg7: memref<8x8x128xf32, #tpu.memory_space<vmem>>, %arg8: memref<8x128xf32, #tpu.memory_space<vmem>>, %arg9: memref<8x128xf32, #tpu.memory_space<vmem>>, %arg10: memref<8x8x128xf32, #tpu.memory_space<vmem>>) attributes {dimension_semantics = [#tpu.dimension_semantics<parallel>, #tpu.dimension_semantics<arbitrary>], iteration_bounds = array<i64: 1, 1>, scalar_prefetch = 0 : i64, scratch_operands = 2 : i64, tpu.core_type = #tpu.core_type<tc>, window_params = [{transform_indices = @transform_0, window_bounds = array<i64: 8, 128>}, {transform_indices = @transform_1, window_bounds = array<i64: 8, 8, 32>}, {pipeline_mode = #tpu.pipeline_mode<synchronous>, transform_indices = @transform_2, window_bounds = array<i64: 32, 128>}, {pipeline_mode = #tpu.pipeline_mode<synchronous>, transform_indices = @transform_3, window_bounds = array<i64: 128, 128>}, {pipeline_mode = #tpu.pipeline_mode<synchronous>, transform_indices = @transform_4, window_bounds = array<i64: 1, 128>}, {transform_indices = @transform_5, window_bounds = array<i64: 8, 8, 128>}, {transform_indices = @transform_6, window_bounds = array<i64: 8, 128>}]} {
    %c0_i32 = arith.constant 0 : i32
    %0 = arith.cmpi eq, %arg1, %c0_i32 : i32
    %1 = arith.extui %0 : i1 to i32
    %c0_i32_0 = arith.constant 0 : i32
    %2 = arith.cmpi ne, %1, %c0_i32_0 : i32
    scf.if %2 {
      %c0_75 = arith.constant 0 : index
      %c0_76 = arith.constant 0 : index
      %136 = vector.load %arg2[%c0_75, %c0_76] : memref<8x128xf32, #tpu.memory_space<vmem>>, vector<8x128xf32>
      %c0_77 = arith.constant 0 : index
      %c0_78 = arith.constant 0 : index
      %137 = vector.load %arg9[%c0_77, %c0_78] : memref<8x128xf32, #tpu.memory_space<vmem>>, vector<8x128xf32>
      tpu.vector_store %arg9[%c0_77, %c0_78], %136 {strides = array<i32>} : memref<8x128xf32, #tpu.memory_space<vmem>>, vector<8x128xf32>,
    } else {
    }
    %c0 = arith.constant 0 : index
    %c0_1 = arith.constant 0 : index
    %c0_2 = arith.constant 0 : index
    %3 = vector.load %arg3[%c0, %c0_1, %c0_2] : memref<8x8x32xf32, #tpu.memory_space<vmem>>, vector<8x8x32xf32>
    %4 = vector.shape_cast %3 : vector<8x8x32xf32> to vector<64x32xf32>
    %c0_3 = arith.constant 0 : index
    %c0_4 = arith.constant 0 : index
    %5 = vector.load %arg4[%c0_3, %c0_4] : memref<32x128xf32, #tpu.memory_space<vmem>>, vector<32x128xf32>
    %cst = arith.constant dense<0.000000e+00> : vector<64x128xf32>
    %6 = tpu.matmul %4, %5, %cst {dimension_numbers = #tpu.dot_dimension_numbers<[1], [0], [0], [1], [0, 0, 1, 1], [], []>} : vector<64x32xf32>, vector<32x128xf32>, vector<64x128xf32> -> vector<64x128xf32>
    %c0_5 = arith.constant 0 : index
    %c0_6 = arith.constant 0 : index
    %7 = vector.load %arg6[%c0_5, %c0_6] : memref<1x128xf32, #tpu.memory_space<vmem>>, vector<1x128xf32>
    %8 = vector.broadcast %7 : vector<1x128xf32> to vector<64x128xf32>
    %9 = arith.addf %6, %8 : vector<64x128xf32>
    %10 = vector.shape_cast %9 : vector<64x128xf32> to vector<8x8x128xf32>
    %c0_7 = arith.constant 0 : index
    %c0_8 = arith.constant 0 : index
    %c0_9 = arith.constant 0 : index
    %11 = vector.load %arg10[%c0_7, %c0_8, %c0_9] : memref<8x8x128xf32, #tpu.memory_space<vmem>>, vector<8x8x128xf32>
    tpu.vector_store %arg10[%c0_7, %c0_8, %c0_9], %10 {strides = array<i32>} : memref<8x8x128xf32, #tpu.memory_space<vmem>>, vector<8x8x128xf32>,
    %c0_10 = arith.constant 0 : index
    %c0_11 = arith.constant 0 : index
    %12 = vector.load %arg5[%c0_10, %c0_11] : memref<128x128xf32, #tpu.memory_space<vmem>>, vector<128x128xf32>
    %c0_12 = arith.constant 0 : index
    %c0_13 = arith.constant 0 : index
    %13 = vector.load %arg9[%c0_12, %c0_13] : memref<8x128xf32, #tpu.memory_space<vmem>>, vector<8x128xf32>
    %c0_i32_14 = arith.constant 0 : i32
    %14 = arith.index_cast %c0_i32_14 : i32 to index
    %c0_15 = arith.constant 0 : index
    %c0_16 = arith.constant 0 : index
    %15 = vector.load %arg10[%14, %c0_15, %c0_16] : memref<8x8x128xf32, #tpu.memory_space<vmem>>, vector<1x8x128xf32>
    %16 = vector.shape_cast %15 : vector<1x8x128xf32> to vector<8x128xf32>
    %cst_17 = arith.constant dense<0.000000e+00> : vector<8x128xf32>
    %17 = tpu.matmul %13, %12, %cst_17 {dimension_numbers = #tpu.dot_dimension_numbers<[1], [0], [0], [1], [0, 0, 1, 1], [], []>} : vector<8x128xf32>, vector<128x128xf32>, vector<8x128xf32> -> vector<8x128xf32>
    %18 = arith.addf %16, %17 : vector<8x128xf32>
    %cst_18 = arith.constant 0.899999976 : f32
    %19 = vector.broadcast %cst_18 : f32 to vector<8x128xf32>
    %20 = arith.mulf %19, %13 : vector<8x128xf32>
    %21 = math.tanh %18 : vector<8x128xf32>
    %cst_19 = arith.constant 1.000000e-01 : f32
    %22 = vector.broadcast %cst_19 : f32 to vector<8x128xf32>
    %23 = arith.mulf %22, %21 : vector<8x128xf32>
    %24 = arith.addf %20, %23 : vector<8x128xf32>
    %25 = arith.index_cast %c0_i32_14 : i32 to index
    %c0_20 = arith.constant 0 : index
    %c0_21 = arith.constant 0 : index
    %26 = vector.load %arg7[%25, %c0_20, %c0_21] : memref<8x8x128xf32, #tpu.memory_space<vmem>>, vector<1x8x128xf32>
    %27 = vector.shape_cast %26 : vector<1x8x128xf32> to vector<8x128xf32>
    %28 = vector.shape_cast %24 : vector<8x128xf32> to vector<1x8x128xf32>
    tpu.vector_store %arg7[%25, %c0_20, %c0_21], %28 {strides = array<i32>} : memref<8x8x128xf32, #tpu.memory_space<vmem>>, vector<1x8x128xf32>,
    %c1_i32 = arith.constant 1 : i32
    %29 = arith.index_cast %c1_i32 : i32 to index
    %c0_22 = arith.constant 0 : index
    %c0_23 = arith.constant 0 : index
    %30 = vector.load %arg10[%29, %c0_22, %c0_23] : memref<8x8x128xf32, #tpu.memory_space<vmem>>, vector<1x8x128xf32>
    %31 = vector.shape_cast %30 : vector<1x8x128xf32> to vector<8x128xf32>
    %cst_24 = arith.constant dense<0.000000e+00> : vector<8x128xf32>
    %32 = tpu.matmul %24, %12, %cst_24 {dimension_numbers = #tpu.dot_dimension_numbers<[1], [0], [0], [1], [0, 0, 1, 1], [], []>} : vector<8x128xf32>, vector<128x128xf32>, vector<8x128xf32> -> vector<8x128xf32>
    %33 = arith.addf %31, %32 : vector<8x128xf32>
    %cst_25 = arith.constant 0.899999976 : f32
    %34 = vector.broadcast %cst_25 : f32 to vector<8x128xf32>
    %35 = arith.mulf %34, %24 : vector<8x128xf32>
    %36 = math.tanh %33 : vector<8x128xf32>
    %cst_26 = arith.constant 1.000000e-01 : f32
    %37 = vector.broadcast %cst_26 : f32 to vector<8x128xf32>
    %38 = arith.mulf %37, %36 : vector<8x128xf32>
    %39 = arith.addf %35, %38 : vector<8x128xf32>
    %40 = arith.index_cast %c1_i32 : i32 to index
    %c0_27 = arith.constant 0 : index
    %c0_28 = arith.constant 0 : index
    %41 = vector.load %arg7[%40, %c0_27, %c0_28] : memref<8x8x128xf32, #tpu.memory_space<vmem>>, vector<1x8x128xf32>
    %42 = vector.shape_cast %41 : vector<1x8x128xf32> to vector<8x128xf32>
    %43 = vector.shape_cast %39 : vector<8x128xf32> to vector<1x8x128xf32>
    tpu.vector_store %arg7[%40, %c0_27, %c0_28], %43 {strides = array<i32>} : memref<8x8x128xf32, #tpu.memory_space<vmem>>, vector<1x8x128xf32>,
    %c2_i32 = arith.constant 2 : i32
    %44 = arith.index_cast %c2_i32 : i32 to index
    %c0_29 = arith.constant 0 : index
    %c0_30 = arith.constant 0 : index
    %45 = vector.load %arg10[%44, %c0_29, %c0_30] : memref<8x8x128xf32, #tpu.memory_space<vmem>>, vector<1x8x128xf32>
    %46 = vector.shape_cast %45 : vector<1x8x128xf32> to vector<8x128xf32>
    %cst_31 = arith.constant dense<0.000000e+00> : vector<8x128xf32>
    %47 = tpu.matmul %39, %12, %cst_31 {dimension_numbers = #tpu.dot_dimension_numbers<[1], [0], [0], [1], [0, 0, 1, 1], [], []>} : vector<8x128xf32>, vector<128x128xf32>, vector<8x128xf32> -> vector<8x128xf32>
    %48 = arith.addf %46, %47 : vector<8x128xf32>
    %cst_32 = arith.constant 0.899999976 : f32
    %49 = vector.broadcast %cst_32 : f32 to vector<8x128xf32>
    %50 = arith.mulf %49, %39 : vector<8x128xf32>
    %51 = math.tanh %48 : vector<8x128xf32>
    %cst_33 = arith.constant 1.000000e-01 : f32
    %52 = vector.broadcast %cst_33 : f32 to vector<8x128xf32>
    %53 = arith.mulf %52, %51 : vector<8x128xf32>
    %54 = arith.addf %50, %53 : vector<8x128xf32>
    %55 = arith.index_cast %c2_i32 : i32 to index
    %c0_34 = arith.constant 0 : index
    %c0_35 = arith.constant 0 : index
    %56 = vector.load %arg7[%55, %c0_34, %c0_35] : memref<8x8x128xf32, #tpu.memory_space<vmem>>, vector<1x8x128xf32>
    %57 = vector.shape_cast %56 : vector<1x8x128xf32> to vector<8x128xf32>
    %58 = vector.shape_cast %54 : vector<8x128xf32> to vector<1x8x128xf32>
    tpu.vector_store %arg7[%55, %c0_34, %c0_35], %58 {strides = array<i32>} : memref<8x8x128xf32, #tpu.memory_space<vmem>>, vector<1x8x128xf32>,
    %c3_i32 = arith.constant 3 : i32
    %59 = arith.index_cast %c3_i32 : i32 to index
    %c0_36 = arith.constant 0 : index
    %c0_37 = arith.constant 0 : index
    %60 = vector.load %arg10[%59, %c0_36, %c0_37] : memref<8x8x128xf32, #tpu.memory_space<vmem>>, vector<1x8x128xf32>
    %61 = vector.shape_cast %60 : vector<1x8x128xf32> to vector<8x128xf32>
    %cst_38 = arith.constant dense<0.000000e+00> : vector<8x128xf32>
    %62 = tpu.matmul %54, %12, %cst_38 {dimension_numbers = #tpu.dot_dimension_numbers<[1], [0], [0], [1], [0, 0, 1, 1], [], []>} : vector<8x128xf32>, vector<128x128xf32>, vector<8x128xf32> -> vector<8x128xf32>
    %63 = arith.addf %61, %62 : vector<8x128xf32>
    %cst_39 = arith.constant 0.899999976 : f32
    %64 = vector.broadcast %cst_39 : f32 to vector<8x128xf32>
    %65 = arith.mulf %64, %54 : vector<8x128xf32>
    %66 = math.tanh %63 : vector<8x128xf32>
    %cst_40 = arith.constant 1.000000e-01 : f32
    %67 = vector.broadcast %cst_40 : f32 to vector<8x128xf32>
    %68 = arith.mulf %67, %66 : vector<8x128xf32>
    %69 = arith.addf %65, %68 : vector<8x128xf32>
    %70 = arith.index_cast %c3_i32 : i32 to index
    %c0_41 = arith.constant 0 : index
    %c0_42 = arith.constant 0 : index
    %71 = vector.load %arg7[%70, %c0_41, %c0_42] : memref<8x8x128xf32, #tpu.memory_space<vmem>>, vector<1x8x128xf32>
    %72 = vector.shape_cast %71 : vector<1x8x128xf32> to vector<8x128xf32>
    %73 = vector.shape_cast %69 : vector<8x128xf32> to vector<1x8x128xf32>
    tpu.vector_store %arg7[%70, %c0_41, %c0_42], %73 {strides = array<i32>} : memref<8x8x128xf32, #tpu.memory_space<vmem>>, vector<1x8x128xf32>,
    %c4_i32 = arith.constant 4 : i32
    %74 = arith.index_cast %c4_i32 : i32 to index
    %c0_43 = arith.constant 0 : index
    %c0_44 = arith.constant 0 : index
    %75 = vector.load %arg10[%74, %c0_43, %c0_44] : memref<8x8x128xf32, #tpu.memory_space<vmem>>, vector<1x8x128xf32>
    %76 = vector.shape_cast %75 : vector<1x8x128xf32> to vector<8x128xf32>
    %cst_45 = arith.constant dense<0.000000e+00> : vector<8x128xf32>
    %77 = tpu.matmul %69, %12, %cst_45 {dimension_numbers = #tpu.dot_dimension_numbers<[1], [0], [0], [1], [0, 0, 1, 1], [], []>} : vector<8x128xf32>, vector<128x128xf32>, vector<8x128xf32> -> vector<8x128xf32>
    %78 = arith.addf %76, %77 : vector<8x128xf32>
    %cst_46 = arith.constant 0.899999976 : f32
    %79 = vector.broadcast %cst_46 : f32 to vector<8x128xf32>
    %80 = arith.mulf %79, %69 : vector<8x128xf32>
    %81 = math.tanh %78 : vector<8x128xf32>
    %cst_47 = arith.constant 1.000000e-01 : f32
    %82 = vector.broadcast %cst_47 : f32 to vector<8x128xf32>
    %83 = arith.mulf %82, %81 : vector<8x128xf32>
    %84 = arith.addf %80, %83 : vector<8x128xf32>
    %85 = arith.index_cast %c4_i32 : i32 to index
    %c0_48 = arith.constant 0 : index
    %c0_49 = arith.constant 0 : index
    %86 = vector.load %arg7[%85, %c0_48, %c0_49] : memref<8x8x128xf32, #tpu.memory_space<vmem>>, vector<1x8x128xf32>
    %87 = vector.shape_cast %86 : vector<1x8x128xf32> to vector<8x128xf32>
    %88 = vector.shape_cast %84 : vector<8x128xf32> to vector<1x8x128xf32>
    tpu.vector_store %arg7[%85, %c0_48, %c0_49], %88 {strides = array<i32>} : memref<8x8x128xf32, #tpu.memory_space<vmem>>, vector<1x8x128xf32>,
    %c5_i32 = arith.constant 5 : i32
    %89 = arith.index_cast %c5_i32 : i32 to index
    %c0_50 = arith.constant 0 : index
    %c0_51 = arith.constant 0 : index
    %90 = vector.load %arg10[%89, %c0_50, %c0_51] : memref<8x8x128xf32, #tpu.memory_space<vmem>>, vector<1x8x128xf32>
    %91 = vector.shape_cast %90 : vector<1x8x128xf32> to vector<8x128xf32>
    %cst_52 = arith.constant dense<0.000000e+00> : vector<8x128xf32>
    %92 = tpu.matmul %84, %12, %cst_52 {dimension_numbers = #tpu.dot_dimension_numbers<[1], [0], [0], [1], [0, 0, 1, 1], [], []>} : vector<8x128xf32>, vector<128x128xf32>, vector<8x128xf32> -> vector<8x128xf32>
    %93 = arith.addf %91, %92 : vector<8x128xf32>
    %cst_53 = arith.constant 0.899999976 : f32
    %94 = vector.broadcast %cst_53 : f32 to vector<8x128xf32>
    %95 = arith.mulf %94, %84 : vector<8x128xf32>
    %96 = math.tanh %93 : vector<8x128xf32>
    %cst_54 = arith.constant 1.000000e-01 : f32
    %97 = vector.broadcast %cst_54 : f32 to vector<8x128xf32>
    %98 = arith.mulf %97, %96 : vector<8x128xf32>
    %99 = arith.addf %95, %98 : vector<8x128xf32>
    %100 = arith.index_cast %c5_i32 : i32 to index
    %c0_55 = arith.constant 0 : index
    %c0_56 = arith.constant 0 : index
    %101 = vector.load %arg7[%100, %c0_55, %c0_56] : memref<8x8x128xf32, #tpu.memory_space<vmem>>, vector<1x8x128xf32>
    %102 = vector.shape_cast %101 : vector<1x8x128xf32> to vector<8x128xf32>
    %103 = vector.shape_cast %99 : vector<8x128xf32> to vector<1x8x128xf32>
    tpu.vector_store %arg7[%100, %c0_55, %c0_56], %103 {strides = array<i32>} : memref<8x8x128xf32, #tpu.memory_space<vmem>>, vector<1x8x128xf32>,
    %c6_i32 = arith.constant 6 : i32
    %104 = arith.index_cast %c6_i32 : i32 to index
    %c0_57 = arith.constant 0 : index
    %c0_58 = arith.constant 0 : index
    %105 = vector.load %arg10[%104, %c0_57, %c0_58] : memref<8x8x128xf32, #tpu.memory_space<vmem>>, vector<1x8x128xf32>
    %106 = vector.shape_cast %105 : vector<1x8x128xf32> to vector<8x128xf32>
    %cst_59 = arith.constant dense<0.000000e+00> : vector<8x128xf32>
    %107 = tpu.matmul %99, %12, %cst_59 {dimension_numbers = #tpu.dot_dimension_numbers<[1], [0], [0], [1], [0, 0, 1, 1], [], []>} : vector<8x128xf32>, vector<128x128xf32>, vector<8x128xf32> -> vector<8x128xf32>
    %108 = arith.addf %106, %107 : vector<8x128xf32>
    %cst_60 = arith.constant 0.899999976 : f32
    %109 = vector.broadcast %cst_60 : f32 to vector<8x128xf32>
    %110 = arith.mulf %109, %99 : vector<8x128xf32>
    %111 = math.tanh %108 : vector<8x128xf32>
    %cst_61 = arith.constant 1.000000e-01 : f32
    %112 = vector.broadcast %cst_61 : f32 to vector<8x128xf32>
    %113 = arith.mulf %112, %111 : vector<8x128xf32>
    %114 = arith.addf %110, %113 : vector<8x128xf32>
    %115 = arith.index_cast %c6_i32 : i32 to index
    %c0_62 = arith.constant 0 : index
    %c0_63 = arith.constant 0 : index
    %116 = vector.load %arg7[%115, %c0_62, %c0_63] : memref<8x8x128xf32, #tpu.memory_space<vmem>>, vector<1x8x128xf32>
    %117 = vector.shape_cast %116 : vector<1x8x128xf32> to vector<8x128xf32>
    %118 = vector.shape_cast %114 : vector<8x128xf32> to vector<1x8x128xf32>
    tpu.vector_store %arg7[%115, %c0_62, %c0_63], %118 {strides = array<i32>} : memref<8x8x128xf32, #tpu.memory_space<vmem>>, vector<1x8x128xf32>,
    %c7_i32 = arith.constant 7 : i32
    %119 = arith.index_cast %c7_i32 : i32 to index
    %c0_64 = arith.constant 0 : index
    %c0_65 = arith.constant 0 : index
    %120 = vector.load %arg10[%119, %c0_64, %c0_65] : memref<8x8x128xf32, #tpu.memory_space<vmem>>, vector<1x8x128xf32>
    %121 = vector.shape_cast %120 : vector<1x8x128xf32> to vector<8x128xf32>
    %cst_66 = arith.constant dense<0.000000e+00> : vector<8x128xf32>
    %122 = tpu.matmul %114, %12, %cst_66 {dimension_numbers = #tpu.dot_dimension_numbers<[1], [0], [0], [1], [0, 0, 1, 1], [], []>} : vector<8x128xf32>, vector<128x128xf32>, vector<8x128xf32> -> vector<8x128xf32>
    %123 = arith.addf %121, %122 : vector<8x128xf32>
    %cst_67 = arith.constant 0.899999976 : f32
    %124 = vector.broadcast %cst_67 : f32 to vector<8x128xf32>
    %125 = arith.mulf %124, %114 : vector<8x128xf32>
    %126 = math.tanh %123 : vector<8x128xf32>
    %cst_68 = arith.constant 1.000000e-01 : f32
    %127 = vector.broadcast %cst_68 : f32 to vector<8x128xf32>
    %128 = arith.mulf %127, %126 : vector<8x128xf32>
    %129 = arith.addf %125, %128 : vector<8x128xf32>
    %130 = arith.index_cast %c7_i32 : i32 to index
    %c0_69 = arith.constant 0 : index
    %c0_70 = arith.constant 0 : index
    %131 = vector.load %arg7[%130, %c0_69, %c0_70] : memref<8x8x128xf32, #tpu.memory_space<vmem>>, vector<1x8x128xf32>
    %132 = vector.shape_cast %131 : vector<1x8x128xf32> to vector<8x128xf32>
    %133 = vector.shape_cast %129 : vector<8x128xf32> to vector<1x8x128xf32>
    tpu.vector_store %arg7[%130, %c0_69, %c0_70], %133 {strides = array<i32>} : memref<8x8x128xf32, #tpu.memory_space<vmem>>, vector<1x8x128xf32>,
    %c8_i32 = arith.constant 8 : i32
    %c0_71 = arith.constant 0 : index
    %c0_72 = arith.constant 0 : index
    %134 = vector.load %arg9[%c0_71, %c0_72] : memref<8x128xf32, #tpu.memory_space<vmem>>, vector<8x128xf32>
    tpu.vector_store %arg9[%c0_71, %c0_72], %129 {strides = array<i32>} : memref<8x128xf32, #tpu.memory_space<vmem>>, vector<8x128xf32>,
    %c0_73 = arith.constant 0 : index
    %c0_74 = arith.constant 0 : index
    %135 = vector.load %arg8[%c0_73, %c0_74] : memref<8x128xf32, #tpu.memory_space<vmem>>, vector<8x128xf32>
    tpu.vector_store %arg8[%c0_73, %c0_74], %129 {strides = array<i32>} : memref<8x128xf32, #tpu.memory_space<vmem>>, vector<8x128xf32>,
    return
  }
  func.func @transform_0(%arg0: i32, %arg1: i32) -> (i32, i32) {
    %c0_i32 = arith.constant 0 : i32
    %c0_i32_0 = arith.constant 0 : i32
    return %arg0, %c0_i32 : i32, i32
  }
  func.func @transform_1(%arg0: i32, %arg1: i32) -> (i32, i32, i32) {
    %c0_i32 = arith.constant 0 : i32
    %c0_i32_0 = arith.constant 0 : i32
    return %arg1, %arg0, %c0_i32 : i32, i32, i32
  }
  func.func @transform_2(%arg0: i32, %arg1: i32) -> (i32, i32) {
    %c0_i32 = arith.constant 0 : i32
    %c0_i32_0 = arith.constant 0 : i32
    %c0_i32_1 = arith.constant 0 : i32
    return %c0_i32, %c0_i32_0 : i32, i32
  }
  func.func @transform_3(%arg0: i32, %arg1: i32) -> (i32, i32) {
    %c0_i32 = arith.constant 0 : i32
    %c0_i32_0 = arith.constant 0 : i32
    %c0_i32_1 = arith.constant 0 : i32
    return %c0_i32, %c0_i32_0 : i32, i32
  }
  func.func @transform_4(%arg0: i32, %arg1: i32) -> (i32, i32) {
    %c0_i32 = arith.constant 0 : i32
    %c0_i32_0 = arith.constant 0 : i32
    %c0_i32_1 = arith.constant 0 : i32
    return %c0_i32, %c0_i32_0 : i32, i32
  }
  func.func @transform_5(%arg0: i32, %arg1: i32) -> (i32, i32, i32) {
    %c0_i32 = arith.constant 0 : i32
    %c0_i32_0 = arith.constant 0 : i32
    return %arg1, %arg0, %c0_i32 : i32, i32, i32
  }
  func.func @transform_6(%arg0: i32, %arg1: i32) -> (i32, i32) {
    %c0_i32 = arith.constant 0 : i32
    %c0_i32_0 = arith.constant 0 : i32
    return %arg0, %c0_i32 : i32, i32
  }
}

</mosaic_0001>

<bundles_post_ra>
// kernel: tpu_custom_call.1
= control target key start
LH: loop header
LB: loop body
LE: loop exit
PB: predicated region body
PF: predicated region fallthrough
CT: control target
= control target key end

     0   :  { %12 = vsyncpa [#allocation5], 0  ;;  %s912_s0 = inlined_call_operand.hbm [shape: f32[8,128], index: 0, kind: input, shape index: {}]   ;;  %s913_s1 = inlined_call_operand.hbm [shape: f32[8,8,32], index: 1, kind: input, shape index: {}]   ;;  %s914_s2 = inlined_call_operand.hbm [shape: f32[32,128], index: 2, kind: input, shape index: {}]   ;;  %s915_s3 = inlined_call_operand.hbm [shape: f32[128,128], index: 3, kind: input, shape index: {}]   ;;  %s916_s4 = inlined_call_operand.vmem [shape: f32[1,128], index: 4, kind: input, shape index: {}]   ;;  %s917_s5 = inlined_call_operand.hbm [shape: f32[8,8,128], index: 5, kind: output, shape index: {0}]   ;;  %s918_s6 = inlined_call_operand.hbm [shape: f32[8,128], index: 6, kind: output, shape index: {1}]  }
   0x1   :  { %13 = vsyncpa [#allocation8], 0 }
   0x2   :  { %14 = vsyncpa [#allocation11], 0 }
   0x3   :  { %15 = vsyncpa [#allocation6], 0  ;;  %s32_s23 = sshll.u32 %s913_s1, 4  ;;  %s33_s23 = int_to_ptr.hbm [resolvable:$true] %s32_s23 }
   0x4   :  { %16 = vsyncpa [#allocation14], 0  ;;  %s654_s24 = smov [#allocation7]   ;;  %s22_s28 = sshll.u32 %s912_s0, 4  ;;  %s23_s28 = int_to_ptr.hbm [resolvable:$true] %s22_s28 }
   0x5   :  { %s34_s25 = sshll.u32 %s654_s24, 4  ;;  %s655_s29 = smov 128   ;;  %s35_s25 = int_to_ptr.vmem [resolvable:$true] %s34_s25 }
   0x6   :  { %s656_s30 = smov 8   ;;  %s657_s7 = smov [#allocation4]  }
   0x7   :  { %40 = dma.hbm_to_vmem [thread:$0]  %s33_s23, 1024, %s35_s25, [#allocation8], %s655_s29, %s655_s29, %s656_s30  }
   0x8   :  { %s24_s8 = sshll.u32 %s657_s7, 4  ;;  %s45_s10 = sshll.u32 %s914_s2, 4  ;;  %s25_s8 = int_to_ptr.vmem [resolvable:$true] %s24_s8  ;;  %s46_s10 = int_to_ptr.hbm [resolvable:$true] %s45_s10 }
   0x9   :  { %27 = dma.hbm_to_vmem [thread:$0]  %s23_s28, 128, %s25_s8, [#allocation5]  }
   0xa   :  { %s58_s0 = sshll.u32 %s915_s3, 4  ;;  %s658_s13 = smov [#allocation9]   ;;  %s59_s0 = int_to_ptr.hbm [resolvable:$true] %s58_s0 }
   0xb   :  { %s47_s14 = sshll.u32 %s658_s13, 4  ;;  %s659_s15 = smov [#allocation10]   ;;  %s48_s14 = int_to_ptr.vmem [resolvable:$true] %s47_s14 }
   0xc   :  { %53 = dma.hbm_to_vmem [thread:$0]  %s46_s10, 512, %s48_s14, [#allocation8], %s655_s29, %s655_s29, %s656_s30  }
   0xd   :  { %s60_s16 = sshll.u32 %s659_s15, 4  ;;  %s61_s16 = int_to_ptr.vmem [resolvable:$true] %s60_s16 }
   0xe   :  { %66 = dma.hbm_to_vmem [thread:$0]  %s59_s0, 2048, %s61_s16, [#allocation11], %s655_s29, %s655_s29, %s656_s30  }
   0xf   :  { %644 = dma.done.wait [#allocation5], 128  }
  0x10   :  { %645 = vsyncadd [#allocation5], 4294967168 }
  0x11   :  { %646 = dma.done.wait [#allocation8], 1536  }
  0x12   :  { %647 = vsyncadd [#allocation8], 4294965760 }
  0x13   :  { %648 = dma.done.wait [#allocation11], 2048  }
  0x14   :  { %649 = vsyncadd [#allocation11], 4294965248  ;;  %v718_v0 = vld [vmem:[#allocation10 + $0x78] sm:$0xff]  ;;  %v720_v1 = vld [vmem:[#allocation10 + $0x70] sm:$0xff]  ;;  %vm107_vm0 = vcmask 261120   ;;  %s436_s20 = sshll.u32 %s917_s5, 4  ;;  %s437_s20 = int_to_ptr.hbm [resolvable:$true] %s436_s20 }
  0x15   :  { %199 = vmatpush.msra.mxu1 %v718_v0  ;;  %227 = vmatpush.msra.mxu2 %v718_v0  ;;  %v724_v2 = vld [vmem:[#allocation10 + $0x68] sm:$0xff]  ;;  %v102_v3 = vld [vmem:[#allocation9 + $0x18] sm:$0xff]  ;;  %v729_v4 = vld [vmem:[#allocation10 + $0x60] sm:$0xff]  ;;  %s661_s21 = smov [#allocation13]   ;;  %s450_s25 = sshll.u32 %s918_s6, 4  ;;  %s451_s25 = int_to_ptr.hbm [resolvable:$true] %s450_s25 }
  0x16   :  { %256 = vmatpush.msra.mxu3 %v718_v0  ;;  %144 = vmatpush.msra.mxu0 %v102_v3  ;;  %v101_v5 = vld [vmem:[#allocation9 + $0x10] sm:$0xff]  ;;  %v100_v6 = vld [vmem:[#allocation9 + $0x8] sm:$0xff]  ;;  %v734_v7 = vld [vmem:[#allocation10 + $0x58] sm:$0xff]  ;;  %s448_s22 = sshll.u32 %s661_s21, 4  ;;  %s449_s22 = int_to_ptr.vmem [resolvable:$true] %s448_s22 }
  0x17   :  { %200 = vmatpush.msra.mxu1 %v720_v1  ;;  %228 = vmatpush.msra.mxu2 %v720_v1  ;;  %v99_v8 = vld [vmem:[#allocation9] sm:$0xff]  ;;  %v739_v9 = vld [vmem:[#allocation10 + $0x50] sm:$0xff]  ;;  %v744_v11 = vld [vmem:[#allocation10 + $0x48] sm:$0xff] }
  0x18   :  { %257 = vmatpush.msra.mxu3 %v720_v1  ;;  %145 = vmatpush.msra.mxu0 %v101_v5  ;;  %v91_v10 = vld [vmem:[#allocation7] sm:$0xff]  ;;  %v755_v13 = vld [vmem:[#allocation10 + $0x38] sm:$0xff]  ;;  %v761_v14 = vld [vmem:[#allocation10 + $0x30] sm:$0xff] }
  0x19   :  { %201 = vmatpush.msra.mxu1 %v724_v2  ;;  %229 = vmatpush.msra.mxu2 %v724_v2  ;;  %v749_v12 = vld [vmem:[#allocation10 + $0x40] sm:$0xff]  ;;  %v767_v15 = vld [vmem:[#allocation10 + $0x28] sm:$0xff]  ;;  %v779_v17 = vld [vmem:[#allocation10 + $0x18] sm:$0xff] }
  0x1a   :  { %258 = vmatpush.msra.mxu3 %v724_v2  ;;  %146 = vmatpush.msra.mxu0 %v100_v6  ;;  %v773_v16 = vld [vmem:[#allocation10 + $0x20] sm:$0xff]  ;;  %v785_v18 = vld [vmem:[#allocation10 + $0x10] sm:$0xff]  ;;  %v791_v19 = vld [vmem:[#allocation10 + $0x8] sm:$0xff] }
  0x1b   :  { %202 = vmatpush.msra.mxu1 %v729_v4  ;;  %230 = vmatpush.msra.mxu2 %v729_v4  ;;  %v797_v20 = vld [vmem:[#allocation10] sm:$0xff]  ;;  %v802_v21 = vld [vmem:[#allocation4] sm:$0xff]  ;;  %v92_v22 = vld [vmem:[#allocation7 + $0x8] sm:$0xff] }
  0x1c   :  { %259 = vmatpush.msra.mxu3 %v729_v4  ;;  %147 = vmatpush.msra.mxu0 %v99_v8  ;;  %v886_v23 = vld [vmem:[%s916_s4] ss:$0 sm:$0xff]  ;;  %v220_v28 = vmul.f32 0.9, %v802_v21  ;;  %v93_v32 = vld [vmem:[#allocation7 + $0x10] sm:$0xff]  ;;  %v95_v50 = vld [vmem:[#allocation7 + $0x20] sm:$0xff] }
  0x1d   :  { %203 = vmatpush.msra.mxu1 %v734_v7  ;;  %231 = vmatpush.msra.mxu2 %v734_v7  ;;  %v94_v41 = vld [vmem:[#allocation7 + $0x18] sm:$0xff]  ;;  %v96_v59 = vld [vmem:[#allocation7 + $0x28] sm:$0xff]  ;;  %s660_s4 = smov [#allocation12]  }
  0x1e   :  { %260 = vmatpush.msra.mxu3 %v734_v7  ;;  %467 = vmatmul.msk.f32.vlgmr.msra.gmra.mxu0 %vm107_vm0, %v91_v10  ;;  %v98_v5 = vld [vmem:[#allocation7 + $0x38] sm:$0xff]  ;;  %s434_s17 = sshll.u32 %s660_s4, 4  ;;  %s435_s17 = int_to_ptr.vmem [resolvable:$true] %s434_s17 }
  0x1f   :  { %204 = vmatpush.msra.mxu1 %v739_v9  ;;  %232 = vmatpush.msra.mxu2 %v739_v9 }
  0x20   :  { %261 = vmatpush.msra.mxu3 %v739_v9  ;;  %372 = vmatpush.msrb.mxu0 %v718_v0 }
  0x21   :  { %205 = vmatpush.msra.mxu1 %v744_v11  ;;  %233 = vmatpush.msra.mxu2 %v744_v11 }
  0x22   :  { %262 = vmatpush.msra.mxu3 %v744_v11  ;;  %373 = vmatpush.msrb.mxu0 %v720_v1 }
  0x23   :  { %206 = vmatpush.msra.mxu1 %v749_v12  ;;  %234 = vmatpush.msra.mxu2 %v749_v12 }
  0x24   :  { %263 = vmatpush.msra.mxu3 %v749_v12  ;;  %374 = vmatpush.msrb.mxu0 %v724_v2 }
  0x25   :  { %207 = vmatpush.msra.mxu1 %v755_v13  ;;  %235 = vmatpush.msra.mxu2 %v755_v13 }
  0x26   :  { %264 = vmatpush.msra.mxu3 %v755_v13  ;;  %375 = vmatpush.msrb.mxu0 %v729_v4 }
  0x27   :  { %208 = vmatpush.msra.mxu1 %v761_v14  ;;  %236 = vmatpush.msra.mxu2 %v761_v14 }
  0x28   :  { %265 = vmatpush.msra.mxu3 %v761_v14  ;;  %376 = vmatpush.msrb.mxu0 %v734_v7 }
  0x29   :  { %209 = vmatpush.msra.mxu1 %v767_v15  ;;  %237 = vmatpush.msra.mxu2 %v767_v15 }
  0x2a   :  { %266 = vmatpush.msra.mxu3 %v767_v15  ;;  %377 = vmatpush.msrb.mxu0 %v739_v9 }
  0x2b   :  { %210 = vmatpush.msra.mxu1 %v773_v16  ;;  %238 = vmatpush.msra.mxu2 %v773_v16 }
  0x2c   :  { %267 = vmatpush.msra.mxu3 %v773_v16  ;;  %378 = vmatpush.msrb.mxu0 %v744_v11 }
  0x2d   :  { %211 = vmatpush.msra.mxu1 %v779_v17  ;;  %239 = vmatpush.msra.mxu2 %v779_v17 }
  0x2e   :  { %268 = vmatpush.msra.mxu3 %v779_v17  ;;  %379 = vmatpush.msrb.mxu0 %v749_v12 }
  0x2f   :  { %212 = vmatpush.msra.mxu1 %v785_v18  ;;  %240 = vmatpush.msra.mxu2 %v785_v18 }
  0x30   :  { %269 = vmatpush.msra.mxu3 %v785_v18  ;;  %380 = vmatpush.msrb.mxu0 %v755_v13 }
  0x31   :  { %213 = vmatpush.msra.mxu1 %v791_v19  ;;  %241 = vmatpush.msra.mxu2 %v791_v19 }
  0x32   :  { %270 = vmatpush.msra.mxu3 %v791_v19  ;;  %381 = vmatpush.msrb.mxu0 %v761_v14 }
  0x33   :  { %214 = vmatpush.msra.mxu1 %v797_v20  ;;  %242 = vmatpush.msra.mxu2 %v797_v20 }
  0x34   :  { %215 = vmatmul.f32.vlgmr.msra.gmra.mxu1 %v802_v21  ;;  %271 = vmatpush.msra.mxu3 %v797_v20 }
  0x35   :  { %285 = vmatpush.msrb.mxu1 %v718_v0  ;;  %314 = vmatpush.msrb.mxu2 %v718_v0 }
  0x36   :  { %343 = vmatpush.msrb.mxu3 %v718_v0  ;;  %382 = vmatpush.msrb.mxu0 %v767_v15 }
  0x37   :  { %286 = vmatpush.msrb.mxu1 %v720_v1  ;;  %315 = vmatpush.msrb.mxu2 %v720_v1 }
  0x38   :  { %344 = vmatpush.msrb.mxu3 %v720_v1  ;;  %383 = vmatpush.msrb.mxu0 %v773_v16 }
  0x39   :  { %287 = vmatpush.msrb.mxu1 %v724_v2  ;;  %316 = vmatpush.msrb.mxu2 %v724_v2 }
  0x3a   :  { %345 = vmatpush.msrb.mxu3 %v724_v2  ;;  %384 = vmatpush.msrb.mxu0 %v779_v17 }
  0x3b   :  { %288 = vmatpush.msrb.mxu1 %v729_v4  ;;  %317 = vmatpush.msrb.mxu2 %v729_v4 }
  0x3c   :  { %346 = vmatpush.msrb.mxu3 %v729_v4  ;;  %385 = vmatpush.msrb.mxu0 %v785_v18 }
  0x3d   :  { %289 = vmatpush.msrb.mxu1 %v734_v7  ;;  %318 = vmatpush.msrb.mxu2 %v734_v7 }
  0x3e   :  { %347 = vmatpush.msrb.mxu3 %v734_v7  ;;  %386 = vmatpush.msrb.mxu0 %v791_v19 }
  0x3f   :  { %290 = vmatpush.msrb.mxu1 %v739_v9  ;;  %319 = vmatpush.msrb.mxu2 %v739_v9 }
  0x40   :  { %348 = vmatpush.msrb.mxu3 %v739_v9  ;;  %387 = vmatpush.msrb.mxu0 %v797_v20 }
  0x41   :  { %291 = vmatpush.msrb.mxu1 %v744_v11  ;;  %320 = vmatpush.msrb.mxu2 %v744_v11 }
  0x42   :  { %349 = vmatpush.msrb.mxu3 %v744_v11  ;;  %468 = vmatmul.msk.f32.gmra.mxu0 %vm107_vm0, %v92_v22 }
  0x43   :  { %292 = vmatpush.msrb.mxu1 %v749_v12  ;;  %321 = vmatpush.msrb.mxu2 %v749_v12 }
  0x44   :  { %350 = vmatpush.msrb.mxu3 %v749_v12 }
  0x45   :  { %293 = vmatpush.msrb.mxu1 %v755_v13  ;;  %322 = vmatpush.msrb.mxu2 %v755_v13 }
  0x46   :  { %351 = vmatpush.msrb.mxu3 %v755_v13 }
  0x47   :  { %294 = vmatpush.msrb.mxu1 %v761_v14  ;;  %323 = vmatpush.msrb.mxu2 %v761_v14 }
  0x48   :  { %352 = vmatpush.msrb.mxu3 %v761_v14 }
  0x49   :  { %295 = vmatpush.msrb.mxu1 %v767_v15  ;;  %324 = vmatpush.msrb.mxu2 %v767_v15 }
  0x4a   :  { %353 = vmatpush.msrb.mxu3 %v767_v15  ;;  %469 = vmatmul.msk.f32.gmra.mxu0 %vm107_vm0, %v93_v32 }
  0x4b   :  { %296 = vmatpush.msrb.mxu1 %v773_v16  ;;  %325 = vmatpush.msrb.mxu2 %v773_v16 }
  0x4c   :  { %354 = vmatpush.msrb.mxu3 %v773_v16 }
  0x4d   :  { %297 = vmatpush.msrb.mxu1 %v779_v17  ;;  %326 = vmatpush.msrb.mxu2 %v779_v17 }
  0x4e   :  { %355 = vmatpush.msrb.mxu3 %v779_v17 }
  0x4f   :  { %298 = vmatpush.msrb.mxu1 %v785_v18  ;;  %327 = vmatpush.msrb.mxu2 %v785_v18 }
  0x50   :  { %356 = vmatpush.msrb.mxu3 %v785_v18 }
  0x51   :  { %299 = vmatpush.msrb.mxu1 %v791_v19  ;;  %328 = vmatpush.msrb.mxu2 %v791_v19 }
  0x52   :  { %357 = vmatpush.msrb.mxu3 %v791_v19  ;;  %470 = vmatmul.msk.f32.gmra.mxu0 %vm107_vm0, %v94_v41 }
  0x53   :  { %300 = vmatpush.msrb.mxu1 %v797_v20  ;;  %329 = vmatpush.msrb.mxu2 %v797_v20 }
  0x54   :  { %358 = vmatpush.msrb.mxu3 %v797_v20 }
  0x55   :  { %401 = vmatpush.msra.mxu1 %v718_v0 }
  0x57   :  { %402 = vmatpush.msra.mxu1 %v720_v1 }
  0x59   :  { %403 = vmatpush.msra.mxu1 %v724_v2 }
  0x5a   :  { %471 = vmatmul.msk.f32.gmra.mxu0 %vm107_vm0, %v95_v50 }
  0x5b   :  { %404 = vmatpush.msra.mxu1 %v729_v4  ;;  %v97_v4 = vld [vmem:[#allocation7 + $0x30] sm:$0xff] }
  0x5d   :  { %405 = vmatpush.msra.mxu1 %v734_v7 }
  0x5f   :  { %406 = vmatpush.msra.mxu1 %v739_v9 }
  0x61   :  { %407 = vmatpush.msra.mxu1 %v744_v11 }
  0x62   :  { %472 = vmatmul.msk.f32.gmra.mxu0 %vm107_vm0, %v96_v59 }
  0x63   :  { %408 = vmatpush.msra.mxu1 %v749_v12 }
  0x65   :  { %409 = vmatpush.msra.mxu1 %v755_v13 }
  0x67   :  { %410 = vmatpush.msra.mxu1 %v761_v14 }
  0x69   :  { %411 = vmatpush.msra.mxu1 %v767_v15 }
  0x6a   :  { %473 = vmatmul.msk.f32.gmra.mxu0 %vm107_vm0, %v97_v4 }
  0x6b   :  { %412 = vmatpush.msra.mxu1 %v773_v16 }
  0x6d   :  { %413 = vmatpush.msra.mxu1 %v779_v17 }
  0x6f   :  { %414 = vmatpush.msra.mxu1 %v785_v18 }
  0x71   :  { %415 = vmatpush.msra.mxu1 %v791_v19 }
  0x72   :  { %474 = vmatmul.msk.f32.gmra.mxu0 %vm107_vm0, %v98_v5 }
  0x73   :  { %416 = vmatpush.msra.mxu1 %v797_v20 }
  0x9b   :  { %v149_v24 = vpop.f32.mrf.mxu0 }
  0x9c   :  { %v150_v25 = vadd.f32 %v886_v23, %v149_v24 }
  0xb1   :  { %v216_v26 = vpop.f32.mrf.mxu1 }
  0xb2   :  { %v219_v27 = vadd.f32 %v216_v26, %v150_v25 }
  0xb4   :  { %484 = vtanh.f32 %v219_v27 }
  0xba   :  { %v485_v29 = vpop.eup %484 }
  0xbb   :  { %v222_v30 = vmul.f32 0.1, %v485_v29 }
  0xbd   :  { %v223_v31 = vadd.f32 %v222_v30, %v220_v28 }
  0xbf   :  { %224 = vst [vmem:[#allocation12] sm:$0xff] %v223_v31  ;;  %243 = vmatmul.f32.vlgmr.msra.gmra.mxu2 %v223_v31  ;;  %v152_v33 = vpop.f32.mrf.mxu0  ;;  %v248_v39 = vmul.f32 0.9, %v223_v31 }
  0xc0   :  { %v153_v34 = vadd.f32 %v886_v23, %v152_v33 }
  0xc7   :  { %v155_v42 = vpop.f32.mrf.mxu0 }
  0xc8   :  { %v156_v43 = vadd.f32 %v886_v23, %v155_v42 }
  0xcf   :  { %v158_v51 = vpop.f32.mrf.mxu0 }
  0xd0   :  { %v159_v52 = vadd.f32 %v886_v23, %v158_v51 }
  0xd7   :  { %v161_v60 = vpop.f32.mrf.mxu0 }
  0xd8   :  { %v162_v61 = vadd.f32 %v886_v23, %v161_v60 }
  0xdf   :  { %v164_v6 = vpop.f32.mrf.mxu0 }
  0xe0   :  { %v165_v7 = vadd.f32 %v886_v23, %v164_v6 }
  0xe7   :  { %v167_v14 = vpop.f32.mrf.mxu0 }
  0xe8   :  { %v168_v16 = vadd.f32 %v886_v23, %v167_v14 }
  0xef   :  { %v170_v15 = vpop.f32.mrf.mxu0 }
  0xf0   :  { %v171_v24 = vadd.f32 %v886_v23, %v170_v15 }
 0x142   :  { %v244_v35 = vpop.f32.mrf.mxu2 }
 0x143   :  { %v247_v36 = vadd.f32 %v244_v35, %v153_v34 }
 0x145   :  { %486 = vtanh.f32 %v247_v36 }
 0x14b   :  { %v487_v37 = vpop.eup %486 }
 0x14c   :  { %v250_v38 = vmul.f32 0.1, %v487_v37 }
 0x14e   :  { %v251_v40 = vadd.f32 %v250_v38, %v248_v39 }
 0x150   :  { %253 = vst [vmem:[#allocation12 + $0x8] sm:$0xff] %v251_v40  ;;  %272 = vmatmul.f32.vlgmr.msra.gmra.mxu3 %v251_v40  ;;  %v277_v48 = vmul.f32 0.9, %v251_v40 }
 0x1d3   :  { %v273_v44 = vpop.f32.mrf.mxu3 }
 0x1d4   :  { %v276_v45 = vadd.f32 %v273_v44, %v156_v43 }
 0x1d6   :  { %488 = vtanh.f32 %v276_v45 }
 0x1dc   :  { %v489_v46 = vpop.eup %488 }
 0x1dd   :  { %v279_v47 = vmul.f32 0.1, %v489_v46 }
 0x1df   :  { %v280_v49 = vadd.f32 %v279_v47, %v277_v48 }
 0x1e1   :  { %282 = vst [vmem:[#allocation12 + $0x10] sm:$0xff] %v280_v49  ;;  %301 = vmatmul.f32.vlgmr.msrb.gmra.mxu1 %v280_v49  ;;  %v306_v57 = vmul.f32 0.9, %v280_v49 }
 0x25e   :  { %v302_v53 = vpop.f32.mrf.mxu1 }
 0x25f   :  { %v305_v54 = vadd.f32 %v302_v53, %v159_v52 }
 0x261   :  { %490 = vtanh.f32 %v305_v54 }
 0x267   :  { %v491_v55 = vpop.eup %490 }
 0x268   :  { %v308_v56 = vmul.f32 0.1, %v491_v55 }
 0x26a   :  { %v309_v58 = vadd.f32 %v308_v56, %v306_v57 }
 0x26c   :  { %311 = vst [vmem:[#allocation12 + $0x18] sm:$0xff] %v309_v58  ;;  %330 = vmatmul.f32.vlgmr.msrb.gmra.mxu2 %v309_v58  ;;  %v335_v2 = vmul.f32 0.9, %v309_v58 }
 0x2ef   :  { %v331_v62 = vpop.f32.mrf.mxu2 }
 0x2f0   :  { %v334_v63 = vadd.f32 %v331_v62, %v162_v61 }
 0x2f2   :  { %492 = vtanh.f32 %v334_v63 }
 0x2f8   :  { %v493_v0 = vpop.eup %492 }
 0x2f9   :  { %v337_v1 = vmul.f32 0.1, %v493_v0 }
 0x2fb   :  { %v338_v3 = vadd.f32 %v337_v1, %v335_v2 }
 0x2fd   :  { %340 = vst [vmem:[#allocation12 + $0x20] sm:$0xff] %v338_v3  ;;  %359 = vmatmul.f32.vlgmr.msrb.gmra.mxu3 %v338_v3  ;;  %v364_v12 = vmul.f32 0.9, %v338_v3 }
 0x380   :  { %v360_v8 = vpop.f32.mrf.mxu3 }
 0x381   :  { %v363_v9 = vadd.f32 %v360_v8, %v165_v7 }
 0x383   :  { %494 = vtanh.f32 %v363_v9 }
 0x389   :  { %v495_v10 = vpop.eup %494 }
 0x38a   :  { %v366_v11 = vmul.f32 0.1, %v495_v10 }
 0x38c   :  { %v367_v13 = vadd.f32 %v366_v11, %v364_v12 }
 0x38e   :  { %369 = vst [vmem:[#allocation12 + $0x28] sm:$0xff] %v367_v13  ;;  %388 = vmatmul.f32.vlgmr.msrb.gmra.mxu0 %v367_v13  ;;  %v393_v20 = vmul.f32 0.9, %v367_v13 }
 0x40b   :  { %v389_v17 = vpop.f32.mrf.mxu0 }
 0x40c   :  { %v392_v18 = vadd.f32 %v389_v17, %v168_v16 }
 0x40e   :  { %496 = vtanh.f32 %v392_v18 }
 0x414   :  { %v497_v19 = vpop.eup %496 }
 0x415   :  { %v395_v21 = vmul.f32 0.1, %v497_v19 }
 0x417   :  { %v396_v22 = vadd.f32 %v395_v21, %v393_v20 }
 0x419   :  { %398 = vst [vmem:[#allocation12 + $0x30] sm:$0xff] %v396_v22  ;;  %417 = vmatmul.f32.vlgmr.msra.gmra.mxu1 %v396_v22  ;;  %v422_v28 = vmul.f32 0.9, %v396_v22 }
 0x496   :  { %v418_v25 = vpop.f32.mrf.mxu1 }
 0x497   :  { %v421_v26 = vadd.f32 %v418_v25, %v171_v24 }
 0x499   :  { %498 = vtanh.f32 %v421_v26 }
 0x49f   :  { %v499_v27 = vpop.eup %498 }
 0x4a0   :  { %v424_v29 = vmul.f32 0.1, %v499_v27 }
 0x4a2   :  { %v425_v30 = vadd.f32 %v424_v29, %v422_v28 }
 0x4a4   :  { %427 = vst [vmem:[#allocation12 + $0x38] sm:$0xff] %v425_v30 }
 0x4a5   :  { %429 = vst [vmem:[#allocation13] sm:$0xff] %v425_v30  ;;  %442 = dma.vmem_to_hbm [thread:$0]  %s435_s17, 1024, %s437_s20, [#allocation6], %s655_s29, %s655_s29, %s656_s30  }
 0x4a6   :  { %453 = dma.vmem_to_hbm [thread:$0]  %s449_s22, 128, %s451_s25, [#allocation14]  }
 0x4a7   :  { %650 = dma.done.wait [#allocation6], 1024  }
 0x4a8   :  { %651 = vsyncadd [#allocation6], 4294966272 }
 0x4a9   :  { %652 = dma.done.wait [#allocation14], 128  }
 0x4aa   :  { %653 = vsyncadd [#allocation14], 4294967168 }
 0x4ab   :  { %462 = vsyncpa [#allocation5], 1 }
 0x4ac   :  { %463 = vsyncpa [#allocation8], 1 }
 0x4ad   :  { %464 = vsyncpa [#allocation11], 1 }
 0x4ae   :  { %465 = vsyncpa [#allocation6], 1 }
 0x4af   :  { %466 = vsyncpa [#allocation14], 1 }

</bundles_post_ra>
